<compile_context>
chip_gen: v5e
topology: v5e:2x2
jax: 0.10.0
libtpu: 0.0.40
codegen_flags: <defaults>
</compile_context>

<pallas_src>
import jax
import jax.numpy as jnp
from jax.experimental import pallas as pl
from jax.experimental.pallas import tpu as pltpu

LAYER_NORM_EPS = 1e-12  # BERT default
_INV_SQRT2 = 0.7071067811865476


def _round_up(x, m):
    return ((x + m - 1) // m) * m


def _mlm_head_kernel(x_ref, w1_ref, b1_ref, gamma_ref, beta_ref,
                     w2_ref, b2_ref, h_out_ref, logits_ref, h_scratch):
    j = pl.program_id(1)

    # ---- transform: dense -> gelu -> LayerNorm, computed once per row tile ----
    @pl.when(j == 0)
    def _():
        x = x_ref[...]
        h = jnp.dot(x.astype(w1_ref.dtype), w1_ref[...],
                    preferred_element_type=jnp.float32)
        h = h + b1_ref[...].astype(jnp.float32)

        # exact-erf gelu (HF "gelu")
        h = 0.5 * h * (1.0 + jax.lax.erf(h * _INV_SQRT2))

        # LayerNorm over the hidden axis
        mean = jnp.mean(h, axis=-1, keepdims=True)
        centered = h - mean
        var = jnp.mean(centered * centered, axis=-1, keepdims=True)
        h = centered * jax.lax.rsqrt(var + LAYER_NORM_EPS)
        h = h * gamma_ref[...].astype(jnp.float32) + beta_ref[...].astype(jnp.float32)

        h_scratch[...] = h
        h_out_ref[...] = h.astype(h_out_ref.dtype)

    # ---- decoder: h @ W2[:, j-tile] + b2[j-tile] ----
    h = h_scratch[...]
    logits = jnp.dot(h.astype(w2_ref.dtype), w2_ref[...],
                     preferred_element_type=jnp.float32)
    logits = logits + b2_ref[...].astype(jnp.float32)
    logits_ref[...] = logits.astype(logits_ref.dtype)


def bert_only_mlm_head(x, w1, b1, gamma, beta, w2, b2, *, tm=256, tn=2048):
    """x: [B, S, H] -> (hidden [B, S, H], logits [B, S, V]).

    Weights are [in, out]; pass bf16 weights to feed the MXU in bf16.
    """
    B, S, H = x.shape
    Hw, V = w2.shape
    assert Hw == H
    M = B * S

    # Row tile: multiple of 8 sublanes, no larger than the (padded) row count.
    tm_eff = _round_up(min(tm, _round_up(M, 8)), 8)
    M_pad = _round_up(M, tm_eff)

    # Vocab tile: multiple of 128 lanes, no larger than the (padded) vocab.
    tn_eff = _round_up(min(tn, _round_up(V, 128)), 128)
    V_pad = _round_up(V, tn_eff)

    x2d = x.reshape(M, H)
    if M_pad != M:
        x2d = jnp.pad(x2d, ((0, M_pad - M), (0, 0)))

    w2p, b2p = w2, b2
    if V_pad != V:
        w2p = jnp.pad(w2, ((0, 0), (0, V_pad - V)))
        b2p = jnp.pad(b2, (0, V_pad - V))

    # Keep 1-D params 2-D so they map onto (sublane, lane) tiles.
    b1_2d = b1.reshape(1, H)
    gamma_2d = gamma.reshape(1, H)
    beta_2d = beta.reshape(1, H)
    b2_2d = b2p.reshape(1, V_pad)

    grid = (M_pad // tm_eff, V_pad // tn_eff)

    def _isz(dt):
        return jnp.dtype(dt).itemsize

    # VMEM budget: double-buffered streamed blocks + resident scratch + params.
    vmem_est = (
        2 * tm_eff * H * _isz(x.dtype)            # x blocks
        + 2 * H * H * _isz(w1.dtype)              # W1 (full, constant block)
        + 2 * H * tn_eff * _isz(w2.dtype)         # W2 vocab tiles
        + 2 * tm_eff * tn_eff * _isz(x.dtype)     # logits tiles
        + 2 * tm_eff * H * _isz(x.dtype)          # hidden output tiles
        + tm_eff * H * 4                          # fp32 h scratch
        + 2 * (3 * H + V_pad) * 4                 # biases / LN params
    )
    vmem_limit = int(min(max(vmem_est + (4 << 20), 16 << 20), 64 << 20))

    cost = pl.CostEstimate(
        flops=int(2 * M_pad * H * (H + V_pad)),
        transcendentals=int(M_pad * H),
        bytes_accessed=int(
            M_pad * H * _isz(x.dtype)                       # read x
            + H * H * _isz(w1.dtype)                        # read W1
            + grid[0] * H * V_pad * _isz(w2.dtype)          # stream W2 per row tile
            + M_pad * H * _isz(x.dtype)                     # write hidden
            + M_pad * V_pad * _isz(x.dtype)                 # write logits
        ),
    )

    hidden2d, logits2d = pl.pallas_call(
        _mlm_head_kernel,
        out_shape=(
            jax.ShapeDtypeStruct((M_pad, H), x.dtype),
            jax.ShapeDtypeStruct((M_pad, V_pad), x.dtype),
        ),
        grid_spec=pltpu.PrefetchScalarGridSpec(
            num_scalar_prefetch=0,
            grid=grid,
            in_specs=[
                pl.BlockSpec((tm_eff, H), lambda i, j: (i, 0)),     # x rows
                pl.BlockSpec((H, H), lambda i, j: (0, 0)),          # W1 (full)
                pl.BlockSpec((1, H), lambda i, j: (0, 0)),          # b1
                pl.BlockSpec((1, H), lambda i, j: (0, 0)),          # LN gamma
                pl.BlockSpec((1, H), lambda i, j: (0, 0)),          # LN beta
                pl.BlockSpec((H, tn_eff), lambda i, j: (0, j)),     # W2 vocab tile
                pl.BlockSpec((1, tn_eff), lambda i, j: (0, j)),     # b2 vocab tile
            ],
            out_specs=[
                pl.BlockSpec((tm_eff, H), lambda i, j: (i, 0)),     # hidden
                pl.BlockSpec((tm_eff, tn_eff), lambda i, j: (i, j)),  # logits
            ],
            scratch_shapes=[pltpu.VMEM((tm_eff, H), jnp.float32)],
        ),
        compiler_params=pltpu.CompilerParams(
            dimension_semantics=("parallel", "arbitrary"),
            vmem_limit_bytes=vmem_limit,
        ),
        cost_estimate=cost,
    )(x2d, w1, b1_2d, gamma_2d, beta_2d, w2p, b2_2d)

    hidden = hidden2d[:M].reshape(B, S, H)
    logits = logits2d[:M, :V].reshape(B, S, V)
    return hidden, logits


if __name__ == "__main__":
    # small config consistent with the module's forward
    B, S, H, V = 2, 8, 32, 128

    key = jax.random.PRNGKey(0)
    k_x, k_w1, k_b1, k_w2 = jax.random.split(key, 4)

    x = jax.random.normal(k_x, (B, S, H), dtype=jnp.float32)

    # deterministic synthetic parameters (shapes follow nn.Linear / nn.LayerNorm)
    w1 = jax.random.normal(k_w1, (H, H), dtype=jnp.float32) * 0.02   # dense weight [in, out]
    b1 = jax.random.normal(k_b1, (H,), dtype=jnp.float32) * 0.02     # dense bias
    gamma = jnp.ones((H,), dtype=jnp.float32)                        # LayerNorm weight
    beta = jnp.zeros((H,), dtype=jnp.float32)                        # LayerNorm bias
    w2 = jax.random.normal(k_w2, (H, V), dtype=jnp.float32) * 0.02   # decoder weight [in, out]
    b2 = jnp.zeros((V,), dtype=jnp.float32)                          # tied bias (zeros init)

    hidden, logits = bert_only_mlm_head(x, w1, b1, gamma, beta, w2, b2)
    jax.block_until_ready((hidden, logits))

    # quick sanity check vs. plain JAX reference
    hr = x.reshape(-1, H) @ w1 + b1
    hr = 0.5 * hr * (1.0 + jax.lax.erf(hr / jnp.sqrt(2.0)))
    mu = hr.mean(-1, keepdims=True)
    va = ((hr - mu) ** 2).mean(-1, keepdims=True)
    hr = (hr - mu) * jax.lax.rsqrt(va + LAYER_NORM_EPS) * gamma + beta
    lr = hr @ w2 + b2
    assert jnp.allclose(hidden.reshape(-1, H), hr, atol=1e-4, rtol=1e-4)
    assert jnp.allclose(logits.reshape(-1, V), lr, atol=1e-4, rtol=1e-4)

    print("KERNEL_OK")
</pallas_src>

<mosaic_0001>
module attributes {stable_mosaic.version = 11 : i64} {
  func.func @_mlm_head_kernel(%arg0: i32, %arg1: i32, %arg2: memref<16x32xf32, #tpu.memory_space<vmem>>, %arg3: memref<32x32xf32, #tpu.memory_space<vmem>>, %arg4: memref<1x32xf32, #tpu.memory_space<vmem>>, %arg5: memref<1x32xf32, #tpu.memory_space<vmem>>, %arg6: memref<1x32xf32, #tpu.memory_space<vmem>>, %arg7: memref<32x128xf32, #tpu.memory_space<vmem>>, %arg8: memref<1x128xf32, #tpu.memory_space<vmem>>, %arg9: memref<16x32xf32, #tpu.memory_space<vmem>>, %arg10: memref<16x128xf32, #tpu.memory_space<vmem>>, %arg11: memref<16x32xf32, #tpu.memory_space<vmem>>) attributes {dimension_semantics = [#tpu.dimension_semantics<parallel>, #tpu.dimension_semantics<arbitrary>], iteration_bounds = array<i64: 1, 1>, scalar_prefetch = 0 : i64, scratch_operands = 1 : i64, tpu.core_type = #tpu.core_type<tc>, window_params = [{transform_indices = @transform_0, window_bounds = array<i64: 16, 32>}, {pipeline_mode = #tpu.pipeline_mode<synchronous>, transform_indices = @transform_1, window_bounds = array<i64: 32, 32>}, {pipeline_mode = #tpu.pipeline_mode<synchronous>, transform_indices = @transform_2, window_bounds = array<i64: 1, 32>}, {pipeline_mode = #tpu.pipeline_mode<synchronous>, transform_indices = @transform_3, window_bounds = array<i64: 1, 32>}, {pipeline_mode = #tpu.pipeline_mode<synchronous>, transform_indices = @transform_4, window_bounds = array<i64: 1, 32>}, {transform_indices = @transform_5, window_bounds = array<i64: 32, 128>}, {transform_indices = @transform_6, window_bounds = array<i64: 1, 128>}, {transform_indices = @transform_7, window_bounds = array<i64: 16, 32>}, {transform_indices = @transform_8, window_bounds = array<i64: 16, 128>}]} {
    %c0_i32 = arith.constant 0 : i32
    %0 = arith.cmpi eq, %arg1, %c0_i32 : i32
    %1 = arith.extui %0 : i1 to i32
    %c0_i32_0 = arith.constant 0 : i32
    %2 = arith.cmpi ne, %1, %c0_i32_0 : i32
    scf.if %2 {
      %c0_8 = arith.constant 0 : index
      %c0_9 = arith.constant 0 : index
      %10 = vector.load %arg2[%c0_8, %c0_9] : memref<16x32xf32, #tpu.memory_space<vmem>>, vector<16x32xf32>
      %c0_10 = arith.constant 0 : index
      %c0_11 = arith.constant 0 : index
      %11 = vector.load %arg3[%c0_10, %c0_11] : memref<32x32xf32, #tpu.memory_space<vmem>>, vector<32x32xf32>
      %cst_12 = arith.constant dense<0.000000e+00> : vector<16x32xf32>
      %12 = tpu.matmul %10, %11, %cst_12 {dimension_numbers = #tpu.dot_dimension_numbers<[1], [0], [0], [1], [0, 0, 1, 1], [], []>} : vector<16x32xf32>, vector<32x32xf32>, vector<16x32xf32> -> vector<16x32xf32>
      %c0_13 = arith.constant 0 : index
      %c0_14 = arith.constant 0 : index
      %13 = vector.load %arg4[%c0_13, %c0_14] : memref<1x32xf32, #tpu.memory_space<vmem>>, vector<1x32xf32>
      %14 = vector.broadcast %13 : vector<1x32xf32> to vector<16x32xf32>
      %15 = arith.addf %12, %14 : vector<16x32xf32>
      %cst_15 = arith.constant 5.000000e-01 : f32
      %16 = vector.broadcast %cst_15 : f32 to vector<16x32xf32>
      %17 = arith.mulf %16, %15 : vector<16x32xf32>
      %cst_16 = arith.constant 0.707106769 : f32
      %18 = vector.broadcast %cst_16 : f32 to vector<16x32xf32>
      %19 = arith.mulf %15, %18 : vector<16x32xf32>
      %20 = math.erf %19 : vector<16x32xf32>
      %cst_17 = arith.constant 1.000000e+00 : f32
      %21 = vector.broadcast %cst_17 : f32 to vector<16x32xf32>
      %22 = arith.addf %21, %20 : vector<16x32xf32>
      %23 = arith.mulf %17, %22 : vector<16x32xf32>
      %cst_18 = arith.constant dense<0.000000e+00> : vector<16xf32>
      %24 = vector.multi_reduction <add>, %23, %cst_18 [1] : vector<16x32xf32> to vector<16xf32>
      %25 = vector.shape_cast %24 : vector<16xf32> to vector<16x1xf32>
      %cst_19 = arith.constant 3.200000e+01 : f32
      %26 = vector.broadcast %cst_19 : f32 to vector<16x1xf32>
      %27 = arith.divf %25, %26 : vector<16x1xf32>
      %28 = vector.broadcast %27 : vector<16x1xf32> to vector<16x32xf32>
      %29 = arith.subf %23, %28 : vector<16x32xf32>
      %30 = arith.mulf %29, %29 : vector<16x32xf32>
      %cst_20 = arith.constant dense<0.000000e+00> : vector<16xf32>
      %31 = vector.multi_reduction <add>, %30, %cst_20 [1] : vector<16x32xf32> to vector<16xf32>
      %32 = vector.shape_cast %31 : vector<16xf32> to vector<16x1xf32>
      %cst_21 = arith.constant 3.200000e+01 : f32
      %33 = vector.broadcast %cst_21 : f32 to vector<16x1xf32>
      %34 = arith.divf %32, %33 : vector<16x1xf32>
      %cst_22 = arith.constant 9.99999996E-13 : f32
      %35 = vector.broadcast %cst_22 : f32 to vector<16x1xf32>
      %36 = arith.addf %34, %35 : vector<16x1xf32>
      %37 = math.rsqrt %36 : vector<16x1xf32>
      %38 = vector.broadcast %37 : vector<16x1xf32> to vector<16x32xf32>
      %39 = arith.mulf %29, %38 : vector<16x32xf32>
      %c0_23 = arith.constant 0 : index
      %c0_24 = arith.constant 0 : index
      %40 = vector.load %arg5[%c0_23, %c0_24] : memref<1x32xf32, #tpu.memory_space<vmem>>, vector<1x32xf32>
      %41 = vector.broadcast %40 : vector<1x32xf32> to vector<16x32xf32>
      %42 = arith.mulf %39, %41 : vector<16x32xf32>
      %c0_25 = arith.constant 0 : index
      %c0_26 = arith.constant 0 : index
      %43 = vector.load %arg6[%c0_25, %c0_26] : memref<1x32xf32, #tpu.memory_space<vmem>>, vector<1x32xf32>
      %44 = vector.broadcast %43 : vector<1x32xf32> to vector<16x32xf32>
      %45 = arith.addf %42, %44 : vector<16x32xf32>
      %c0_27 = arith.constant 0 : index
      %c0_28 = arith.constant 0 : index
      %46 = vector.load %arg11[%c0_27, %c0_28] : memref<16x32xf32, #tpu.memory_space<vmem>>, vector<16x32xf32>
      tpu.vector_store %arg11[%c0_27, %c0_28], %45 {strides = array<i32>} : memref<16x32xf32, #tpu.memory_space<vmem>>, vector<16x32xf32>,
      %c0_29 = arith.constant 0 : index
      %c0_30 = arith.constant 0 : index
      %47 = vector.load %arg9[%c0_29, %c0_30] : memref<16x32xf32, #tpu.memory_space<vmem>>, vector<16x32xf32>
      tpu.vector_store %arg9[%c0_29, %c0_30], %45 {strides = array<i32>} : memref<16x32xf32, #tpu.memory_space<vmem>>, vector<16x32xf32>,
    } else {
    }
    %c0 = arith.constant 0 : index
    %c0_1 = arith.constant 0 : index
    %3 = vector.load %arg11[%c0, %c0_1] : memref<16x32xf32, #tpu.memory_space<vmem>>, vector<16x32xf32>
    %c0_2 = arith.constant 0 : index
    %c0_3 = arith.constant 0 : index
    %4 = vector.load %arg7[%c0_2, %c0_3] : memref<32x128xf32, #tpu.memory_space<vmem>>, vector<32x128xf32>
    %cst = arith.constant dense<0.000000e+00> : vector<16x128xf32>
    %5 = tpu.matmul %3, %4, %cst {dimension_numbers = #tpu.dot_dimension_numbers<[1], [0], [0], [1], [0, 0, 1, 1], [], []>} : vector<16x32xf32>, vector<32x128xf32>, vector<16x128xf32> -> vector<16x128xf32>
    %c0_4 = arith.constant 0 : index
    %c0_5 = arith.constant 0 : index
    %6 = vector.load %arg8[%c0_4, %c0_5] : memref<1x128xf32, #tpu.memory_space<vmem>>, vector<1x128xf32>
    %7 = vector.broadcast %6 : vector<1x128xf32> to vector<16x128xf32>
    %8 = arith.addf %5, %7 : vector<16x128xf32>
    %c0_6 = arith.constant 0 : index
    %c0_7 = arith.constant 0 : index
    %9 = vector.load %arg10[%c0_6, %c0_7] : memref<16x128xf32, #tpu.memory_space<vmem>>, vector<16x128xf32>
    tpu.vector_store %arg10[%c0_6, %c0_7], %8 {strides = array<i32>} : memref<16x128xf32, #tpu.memory_space<vmem>>, vector<16x128xf32>,
    return
  }
  func.func @transform_0(%arg0: i32, %arg1: i32) -> (i32, i32) {
    %c0_i32 = arith.constant 0 : i32
    %c0_i32_0 = arith.constant 0 : i32
    return %arg0, %c0_i32 : i32, i32
  }
  func.func @transform_1(%arg0: i32, %arg1: i32) -> (i32, i32) {
    %c0_i32 = arith.constant 0 : i32
    %c0_i32_0 = arith.constant 0 : i32
    %c0_i32_1 = arith.constant 0 : i32
    return %c0_i32, %c0_i32_0 : i32, i32
  }
  func.func @transform_2(%arg0: i32, %arg1: i32) -> (i32, i32) {
    %c0_i32 = arith.constant 0 : i32
    %c0_i32_0 = arith.constant 0 : i32
    %c0_i32_1 = arith.constant 0 : i32
    return %c0_i32, %c0_i32_0 : i32, i32
  }
  func.func @transform_3(%arg0: i32, %arg1: i32) -> (i32, i32) {
    %c0_i32 = arith.constant 0 : i32
    %c0_i32_0 = arith.constant 0 : i32
    %c0_i32_1 = arith.constant 0 : i32
    return %c0_i32, %c0_i32_0 : i32, i32
  }
  func.func @transform_4(%arg0: i32, %arg1: i32) -> (i32, i32) {
    %c0_i32 = arith.constant 0 : i32
    %c0_i32_0 = arith.constant 0 : i32
    %c0_i32_1 = arith.constant 0 : i32
    return %c0_i32, %c0_i32_0 : i32, i32
  }
  func.func @transform_5(%arg0: i32, %arg1: i32) -> (i32, i32) {
    %c0_i32 = arith.constant 0 : i32
    %c0_i32_0 = arith.constant 0 : i32
    return %c0_i32, %arg1 : i32, i32
  }
  func.func @transform_6(%arg0: i32, %arg1: i32) -> (i32, i32) {
    %c0_i32 = arith.constant 0 : i32
    %c0_i32_0 = arith.constant 0 : i32
    return %c0_i32, %arg1 : i32, i32
  }
  func.func @transform_7(%arg0: i32, %arg1: i32) -> (i32, i32) {
    %c0_i32 = arith.constant 0 : i32
    %c0_i32_0 = arith.constant 0 : i32
    return %arg0, %c0_i32 : i32, i32
  }
  func.func @transform_8(%arg0: i32, %arg1: i32) -> (i32, i32) {
    %c0_i32 = arith.constant 0 : i32
    return %arg0, %arg1 : i32, i32
  }
}

</mosaic_0001>

<bundles_post_ra>
// kernel: tpu_custom_call.1
= control target key start
LH: loop header
LB: loop body
LE: loop exit
PB: predicated region body
PF: predicated region fallthrough
CT: control target
= control target key end

     0   :  { %14 = vsyncpa [#allocation4], 0  ;;  %s645_s0 = inlined_call_operand.hbm [shape: f32[16,32], index: 0, kind: input, shape index: {}]   ;;  %s646_s1 = inlined_call_operand.hbm [shape: f32[32,32], index: 1, kind: input, shape index: {}]   ;;  %s647_s2 = inlined_call_operand.vmem [shape: f32[1,32], index: 2, kind: input, shape index: {}]   ;;  %s648_s3 = inlined_call_operand.vmem [shape: f32[1,32], index: 3, kind: input, shape index: {}]   ;;  %s649_s4 = inlined_call_operand.vmem [shape: f32[1,32], index: 4, kind: input, shape index: {}]   ;;  %s650_s5 = inlined_call_operand.hbm [shape: f32[32,128], index: 5, kind: input, shape index: {}]   ;;  %s651_s6 = inlined_call_operand.vmem [shape: f32[1,128], index: 6, kind: input, shape index: {}]   ;;  %s652_s7 = inlined_call_operand.hbm [shape: f32[16,32], index: 7, kind: output, shape index: {0}]   ;;  %s653_s8 = inlined_call_operand.hbm [shape: f32[16,128], index: 8, kind: output, shape index: {1}]  }
   0x1   :  { %15 = vsyncpa [#allocation7], 0 }
   0x2   :  { %16 = vsyncpa [#allocation5], 0 }
   0x3   :  { %17 = vsyncpa [#allocation11], 0  ;;  %s35_s29 = sshll.u32 %s646_s1, 4  ;;  %s520_s30 = smov [#allocation6]   ;;  %s36_s29 = int_to_ptr.hbm [resolvable:$true] %s35_s29 }
   0x4   :  { %s37_s9 = sshll.u32 %s520_s30, 4  ;;  %s22_s12 = sshll.u32 %s645_s0, 4  ;;  %s38_s9 = int_to_ptr.vmem [resolvable:$true] %s37_s9  ;;  %s23_s12 = int_to_ptr.hbm [resolvable:$true] %s22_s12 }
   0x5   :  { %s521_s13 = smov 128   ;;  %s522_s14 = smov 8  }
   0x6   :  { %43 = dma.hbm_to_vmem [thread:$0]  %s36_s29, 512, %s38_s9, [#allocation7], %s521_s13, %s521_s13, %s522_s14  }
   0x7   :  { %s523_s15 = smov [#allocation3]   ;;  %s54_s1 = sshll.u32 %s650_s5, 4  ;;  %s55_s1 = int_to_ptr.hbm [resolvable:$true] %s54_s1 }
   0x8   :  { %s24_s16 = sshll.u32 %s523_s15, 4  ;;  %s524_s0 = smov [#allocation8]   ;;  %s25_s16 = int_to_ptr.vmem [resolvable:$true] %s24_s16 }
   0x9   :  { %30 = dma.hbm_to_vmem [thread:$0]  %s23_s12, 256, %s25_s16, [#allocation4], %s521_s13, %s521_s13, %s522_s14  }
   0xa   :  { %s56_s19 = sshll.u32 %s524_s0, 4  ;;  %s57_s19 = int_to_ptr.vmem [resolvable:$true] %s56_s19 }
   0xb   :  { %62 = dma.hbm_to_vmem [thread:$0]  %s55_s1, 512, %s57_s19, [#allocation7], %s521_s13, %s521_s13, %s522_s14  }
   0xc   :  { %512 = dma.done.wait [#allocation4], 256  }
   0xd   :  { %513 = vsyncadd [#allocation4], 4294967040 }
   0xe   :  { %514 = dma.done.wait [#allocation7], 1024  }
   0xf   :  { %515 = vsyncadd [#allocation7], 4294966272  ;;  %v86_v0 = vld [vmem:[#allocation6 + $0x18] sm:$0xff]  ;;  %v85_v1 = vld [vmem:[#allocation6 + $0x10] sm:$0xff]  ;;  %vm91_vm0 = vcmask 261120   ;;  %s324_s26 = sshll.u32 %s652_s7, 4  ;;  %s325_s26 = int_to_ptr.hbm [resolvable:$true] %s324_s26 }
  0x10   :  { %110 = vmatpush.msra.mxu0 %v86_v0  ;;  %362 = vmatpush.msra.mxu2 %v86_v0  ;;  %v84_v2 = vld [vmem:[#allocation6 + $0x8] sm:$0xff]  ;;  %v83_v3 = vld [vmem:[#allocation6] sm:$0xff]  ;;  %v81_v4 = vld [vmem:[#allocation3] sm:$0xff]  ;;  %s527_s29 = smov [#allocation10]   ;;  %s337_s11 = sshll.u32 %s653_s8, 4  ;;  %s338_s11 = int_to_ptr.hbm [resolvable:$true] %s337_s11 }
  0x11   :  { %v82_v5 = vld [vmem:[#allocation3 + $0x8] sm:$0xff]  ;;  %v378_v6 = vld [vmem:[%s647_s2] ss:$0 sm:$0xff]  ;;  %s335_s30 = sshll.u32 %s527_s29, 4  ;;  %s336_s30 = int_to_ptr.vmem [resolvable:$true] %s335_s30 }
  0x12   :  { %111 = vmatpush.msra.mxu0 %v85_v1  ;;  %363 = vmatpush.msra.mxu2 %v85_v1 }
  0x14   :  { %112 = vmatpush.msra.mxu0 %v84_v2  ;;  %364 = vmatpush.msra.mxu2 %v84_v2 }
  0x16   :  { %113 = vmatpush.msra.mxu0 %v83_v3  ;;  %365 = vmatpush.msra.mxu2 %v83_v3 }
  0x17   :  { %356 = vmatmul.msk.f32.vlgmr.msra.gmra.mxu0 %vm91_vm0, %v81_v4  ;;  %357 = vmatmul.msk.f32.vlgmr.msra.gmra.mxu2 %vm91_vm0, %v82_v5 }
  0x94   :  { %v115_v7 = vpop.f32.mrf.mxu0 }
  0x95   :  { %v596_v8 = vadd.f32 %v378_v6, %v115_v7 }
  0x97   :  { %v599_v9 = vmul.f32 0.70710677, %v596_v8 }
  0x99   :  { %v125_v10 = vmul.f32 %v599_v9, %v599_v9 }
  0x9a   :  { %v118_v11 = vpop.f32.mrf.mxu2 }
  0x9b   :  { %v126_v12 = vmin.f32 %v125_v10, 16.0  ;;  %v603_v13 = vadd.f32 %v378_v6, %v118_v11 }
  0x9d   :  { %v127_v14 = vmul.f32 2.1237322e-06, %v126_v12  ;;  %v606_v15 = vmul.f32 0.70710677, %v603_v13  ;;  %v138_v16 = vmul.f32 3.8918573e-05, %v126_v12 }
  0x9f   :  { %v165_v17 = vmul.f32 %v606_v15, %v606_v15  ;;  %v139_v18 = vadd.f32 0.001143296, %v138_v16  ;;  %v128_v19 = vadd.f32 0.00028619796, %v127_v14 }
  0xa1   :  { %v166_v20 = vmin.f32 %v165_v17, 16.0  ;;  %v140_v21 = vmul.f32 %v139_v18, %v126_v12  ;;  %v129_v25 = vmul.f32 %v128_v19, %v126_v12 }
  0xa3   :  { %v167_v22 = vmul.f32 2.1237322e-06, %v166_v20  ;;  %v178_v23 = vmul.f32 3.8918573e-05, %v166_v20  ;;  %v141_v24 = vadd.f32 0.014752088, %v140_v21 }
  0xa4   :  { %v130_v32 = vadd.f32 0.0036580483, %v129_v25 }
  0xa5   :  { %v168_v26 = vadd.f32 0.00028619796, %v167_v22  ;;  %v179_v27 = vadd.f32 0.001143296, %v178_v23  ;;  %v142_v28 = vmul.f32 %v141_v24, %v126_v12  ;;  %v122_v22 = vmul.f32 0.5, %v603_v13 }
  0xa6   :  { %v131_v38 = vmul.f32 %v130_v32, %v126_v12 }
  0xa7   :  { %v169_v29 = vmul.f32 %v168_v26, %v166_v20  ;;  %v180_v30 = vmul.f32 %v179_v27, %v166_v20  ;;  %v143_v31 = vadd.f32 0.112945676, %v142_v28  ;;  %v121_v28 = vmul.f32 0.5, %v596_v8 }
  0xa8   :  { %v132_v44 = vadd.f32 0.05243302, %v131_v38 }
  0xa9   :  { %v170_v33 = vadd.f32 0.0036580483, %v169_v29  ;;  %v181_v34 = vadd.f32 0.014752088, %v180_v30  ;;  %v144_v35 = vmul.f32 %v143_v31, %v126_v12  ;;  %v525_v29 = vmov 32.0  }
  0xaa   :  { %v133_v48 = vmul.f32 %v132_v44, %v126_v12  ;;  %v281_v44 = vld [vmem:[#allocation8 + $0x18] sm:$0xff] }
  0xab   :  { %v182_v36 = vmul.f32 %v181_v34, %v166_v20  ;;  %v145_v37 = vadd.f32 0.4994258, %v144_v35  ;;  %v171_v39 = vmul.f32 %v170_v33, %v166_v20  ;;  %366 = vmatpush.msra.mxu3 %v281_v44  ;;  %305 = vmatpush.msra.mxu1 %v281_v44 }
  0xac   :  { %v134_v52 = vadd.f32 0.18741608, %v133_v48  ;;  %v279_v48 = vld [vmem:[#allocation8 + $0x8] sm:$0xff] }
  0xad   :  { %v183_v40 = vadd.f32 0.112945676, %v182_v36  ;;  %v146_v41 = vmul.f32 %v145_v37, %v126_v12  ;;  %v172_v45 = vadd.f32 0.05243302, %v171_v39 }
  0xae   :  { %v135_v57 = vmul.f32 %v134_v52, %v126_v12 }
  0xaf   :  { %v184_v42 = vmul.f32 %v183_v40, %v166_v20  ;;  %v147_v43 = vadd.f32 1.0, %v146_v41  ;;  %v173_v49 = vmul.f32 %v172_v45, %v166_v20 }
  0xb0   :  { %v136_v1 = vadd.f32 1.1283791, %v135_v57 }
  0xb1   :  { %v185_v46 = vadd.f32 0.4994258, %v184_v42  ;;  %382 = vrcp.f32 %v147_v43  ;;  %v174_v53 = vadd.f32 0.18741608, %v173_v49  ;;  %v159_v62 = vand.u32 2147483648, %v147_v43 }
  0xb2   :  { %vm153_vm2 = vweird.f32 %v147_v43  ;;  %v157_v0 = vand.u32 2147483647, %v147_v43  ;;  %v137_v14 = vmul.f32 %v136_v1, %v599_v9  ;;  %v380_v1 = vld [vmem:[%s649_s4] ss:$0 sm:$0xff] }
  0xb3   :  { %v186_v47 = vmul.f32 %v185_v46, %v166_v20  ;;  %v175_v58 = vmul.f32 %v174_v53, %v166_v20  ;;  %v160_v7 = vor.u32 1.1754944e-38, %v159_v62  ;;  %v280_v46 = vld [vmem:[#allocation8 + $0x10] sm:$0xff]  ;;  %v379_v62 = vld [vmem:[%s648_s3] ss:$0 sm:$0xff]  ;;  %s526_s3 = smov [#allocation9]  }
  0xb4   :  { %vm158_vm6 = vcmp.eq.f32.partialorder %v157_v0, 8.507059e+37  ;;  %367 = vmatpush.msra.mxu3 %v280_v46  ;;  %306 = vmatpush.msra.mxu1 %v280_v46  ;;  %s322_s4 = sshll.u32 %s526_s3, 4  ;;  %s323_s4 = int_to_ptr.vmem [resolvable:$true] %s322_s4 }
  0xb5   :  { %v187_v50 = vadd.f32 1.0, %v186_v47  ;;  %v176_v2 = vadd.f32 1.1283791, %v175_v58 }
  0xb6   :  { %368 = vmatpush.msra.mxu3 %v279_v48  ;;  %307 = vmatpush.msra.mxu1 %v279_v48 }
  0xb7   :  { %384 = vrcp.f32 %v187_v50  ;;  %v383_v51 = vpop.eup %382  ;;  %v199_v3 = vand.u32 2147483648, %v187_v50  ;;  %v197_v5 = vand.u32 2147483647, %v187_v50  ;;  %vm193_vm5 = vweird.f32 %v187_v50 }
  0xb8   :  { %v149_v54 = vmul.f32 %v383_v51, %v147_v43  ;;  %vm154_vm1 = vweird.f32 %v383_v51  ;;  %v177_v16 = vmul.f32 %v176_v2, %v606_v15  ;;  %386 = vrcp.f32 %v525_v29 }
  0xb9   :  { %vm155_vm3 = vmor %vm153_vm2, %vm154_vm1  ;;  %v200_v11 = vor.u32 1.1754944e-38, %v199_v3  ;;  %vm198_vm8 = vcmp.eq.f32.partialorder %v197_v5, 8.507059e+37 }
  0xba   :  { %v150_v55 = vsub.f32 1.0, %v149_v54 }
  0xbc   :  { %v151_v59 = vmul.f32 %v383_v51, %v150_v55 }
  0xbd   :  { %v385_v56 = vpop.eup %384 }
  0xbe   :  { %v189_v60 = vmul.f32 %v385_v56, %v187_v50  ;;  %v152_v61 = vadd.f32 %v383_v51, %v151_v59  ;;  %vm194_vm4 = vweird.f32 %v385_v56  ;;  %v387_v30 = vpop.eup %386  ;;  %v278_v50 = vld [vmem:[#allocation8] sm:$0xff] }
  0xbf   :  { %vm195_vm7 = vmor %vm193_vm5, %vm194_vm4  ;;  %v216_v31 = vmul.f32 32.0, %v387_v30  ;;  %vm220_vm9 = vweird.f32 %v387_v30  ;;  %369 = vmatpush.msra.mxu3 %v278_v50  ;;  %308 = vmatpush.msra.mxu1 %v278_v50 }
  0xc0   :  { %v190_v63 = vsub.f32 1.0, %v189_v60  ;;  %v156_v6 = vsel %vm155_vm3, %v383_v51, %v152_v61 }
  0xc1   :  { %v161_v12 = vsel %vm158_vm6, %v160_v7, %v156_v6  ;;  %v217_v32 = vsub.f32 1.0, %v216_v31 }
  0xc2   :  { %v191_v4 = vmul.f32 %v385_v56, %v190_v63  ;;  %v162_v20 = vmul.f32 %v161_v12, %v137_v14 }
  0xc3   :  { %v218_v33 = vmul.f32 %v387_v30, %v217_v32 }
  0xc4   :  { %v192_v10 = vadd.f32 %v385_v56, %v191_v4  ;;  %v358_v24 = vclamps-f32 %v162_v20, 1.0 }
  0xc5   :  { %v219_v13 = vadd.f32 %v387_v30, %v218_v33 }
  0xc6   :  { %v196_v17 = vsel %vm195_vm7, %v385_v56, %v192_v10  ;;  %v205_v27 = vadd.f32 1.0, %v358_v24 }
  0xc7   :  { %v201_v18 = vsel %vm198_vm8, %v200_v11, %v196_v17  ;;  %v221_v34 = vsel %vm220_vm9, %v387_v30, %v219_v13 }
  0xc8   :  { %v202_v19 = vmul.f32 %v201_v18, %v177_v16  ;;  %v207_v9 = vmul.f32 %v205_v27, %v121_v28  ;;  %v381_v18 = vld [vmem:[%s651_s6] ss:$0 sm:$0xff] }
  0xca   :  { %v359_v21 = vclamps-f32 %v202_v19, 1.0  ;;  %v209_v15 = vsel %vm91_vm0, %v207_v9, 0.0 }
  0xcc   :  { %v206_v23 = vadd.f32 1.0, %v359_v21 }
  0xce   :  { %v208_v25 = vmul.f32 %v206_v23, %v122_v22 }
  0xd0   :  { %v212_v26 = vsel %vm91_vm0, %v208_v25, 0.0 }
  0xd1   :  { %213 = vadd.xlane.f32.xlu0 %v212_v26 }
  0xd9   :  { %210 = vadd.xlane.f32.xlu0 %v209_v15 }
 0x144   :  { %v214_v35 = vpop.xlane.xlu0 %213 }
 0x145   :  { %v223_v36 = vmul.f32 %v221_v34, %v214_v35 }
 0x147   :  { %v225_v37 = vsub.f32 %v208_v25, %v223_v36 }
 0x149   :  { %v227_v38 = vmul.f32 %v225_v37, %v225_v37 }
 0x14b   :  { %v231_v39 = vsel %vm91_vm0, %v227_v38, 0.0 }
 0x14c   :  { %232 = vadd.xlane.f32.xlu1 %v231_v39  ;;  %v211_v8 = vpop.xlane.xlu0 %210 }
 0x14d   :  { %v222_v40 = vmul.f32 %v221_v34, %v211_v8 }
 0x14f   :  { %v224_v41 = vsub.f32 %v207_v9, %v222_v40 }
 0x151   :  { %v226_v42 = vmul.f32 %v224_v41, %v224_v41 }
 0x153   :  { %v228_v43 = vsel %vm91_vm0, %v226_v42, 0.0 }
 0x154   :  { %229 = vadd.xlane.f32.xlu1 %v228_v43 }
 0x1bf   :  { %v233_v45 = vpop.xlane.xlu1 %232 }
 0x1c0   :  { %v235_v47 = vmul.f32 %v233_v45, %v221_v34 }
 0x1c2   :  { %v237_v49 = vadd.f32 1e-12, %v235_v47 }
 0x1c4   :  { %388 = vrsqrt.f32 %v237_v49  ;;  %vm254_vm11 = vweird.f32 %v237_v49 }
 0x1c7   :  { %v230_v51 = vpop.xlane.xlu1 %229 }
 0x1c8   :  { %v234_v52 = vmul.f32 %v230_v51, %v221_v34 }
 0x1ca   :  { %v389_v53 = vpop.eup %388  ;;  %v236_v54 = vadd.f32 1e-12, %v234_v52 }
 0x1cb   :  { %v249_v55 = vmul.f32 %v389_v53, %v237_v49  ;;  %vm255_vm10 = vweird.f32 %v389_v53 }
 0x1cc   :  { %390 = vrsqrt.f32 %v236_v54  ;;  %vm256_vm12 = vmor %vm254_vm11, %vm255_vm10  ;;  %vm244_vm14 = vweird.f32 %v236_v54 }
 0x1cd   :  { %v250_v56 = vmul.f32 %v389_v53, %v249_v55 }
 0x1cf   :  { %v251_v57 = vmul.f32 0.5, %v250_v56 }
 0x1d1   :  { %v252_v58 = vsub.f32 1.5, %v251_v57 }
 0x1d2   :  { %v391_v59 = vpop.eup %390 }
 0x1d3   :  { %v253_v60 = vmul.f32 %v389_v53, %v252_v58  ;;  %v239_v61 = vmul.f32 %v391_v59, %v236_v54  ;;  %vm245_vm13 = vweird.f32 %v391_v59 }
 0x1d4   :  { %vm246_vm15 = vmor %vm244_vm14, %vm245_vm13 }
 0x1d5   :  { %v257_v63 = vsel %vm256_vm12, %v389_v53, %v253_v60  ;;  %v240_v0 = vmul.f32 %v391_v59, %v239_v61 }
 0x1d6   :  { %v259_v2 = vmul.f32 %v257_v63, %v225_v37 }
 0x1d7   :  { %v241_v3 = vmul.f32 0.5, %v240_v0 }
 0x1d8   :  { %v265_v4 = vmul.f32 %v379_v62, %v259_v2 }
 0x1d9   :  { %v242_v5 = vsub.f32 1.5, %v241_v3 }
 0x1da   :  { %v271_v6 = vadd.f32 %v380_v1, %v265_v4 }
 0x1db   :  { %v243_v7 = vmul.f32 %v391_v59, %v242_v5 }
 0x1dc   :  { %273 = vst.msk [vmem:[#allocation2 + $0x8] sm:$0xff] %vm91_vm0, %v271_v6 }
 0x1dd   :  { %275 = vst.msk [vmem:[#allocation9 + $0x8] sm:$0xff] %vm91_vm0, %v271_v6  ;;  %v247_v10 = vsel %vm246_vm15, %v391_v59, %v243_v7 }
 0x1de   :  { %v258_v11 = vmul.f32 %v247_v10, %v224_v41 }
 0x1e0   :  { %v264_v12 = vmul.f32 %v379_v62, %v258_v11 }
 0x1e2   :  { %v270_v14 = vadd.f32 %v380_v1, %v264_v12 }
 0x1e3   :  { %v277_v16 = vld [vmem:[#allocation2 + $0x8] sm:$0xff] }
 0x1e4   :  { %272 = vst.msk [vmem:[#allocation2] sm:$0xff] %vm91_vm0, %v270_v14  ;;  %361 = vmatmul.msk.f32.vlgmr.msra.gmra.mxu3 %vm91_vm0, %v277_v16 }
 0x1e5   :  { %274 = vst.msk [vmem:[#allocation9] sm:$0xff] %vm91_vm0, %v270_v14 }
 0x1e6   :  { %330 = dma.vmem_to_hbm [thread:$0]  %s323_s4, 256, %s325_s26, [#allocation5], %s521_s13, %s521_s13, %s522_s14  }
 0x1eb   :  { %v276_v17 = vld [vmem:[#allocation2] sm:$0xff] }
 0x1ec   :  { %360 = vmatmul.msk.f32.vlgmr.msra.gmra.mxu1 %vm91_vm0, %v276_v17 }
 0x267   :  { %v313_v19 = vpop.f32.mrf.mxu3 }
 0x268   :  { %v314_v20 = vadd.f32 %v381_v18, %v313_v19 }
 0x269   :  { %v310_v21 = vpop.f32.mrf.mxu1 }
 0x26a   :  { %317 = vst [vmem:[#allocation10 + $0x8] sm:$0xff] %v314_v20  ;;  %v311_v22 = vadd.f32 %v381_v18, %v310_v21 }
 0x26c   :  { %316 = vst [vmem:[#allocation10] sm:$0xff] %v311_v22 }
 0x26d   :  { %343 = dma.vmem_to_hbm [thread:$0]  %s336_s30, 256, %s338_s11, [#allocation11], %s521_s13, %s521_s13, %s522_s14  }
 0x26e   :  { %516 = dma.done.wait [#allocation5], 256  }
 0x26f   :  { %517 = vsyncadd [#allocation5], 4294967040 }
 0x270   :  { %518 = dma.done.wait [#allocation11], 256  }
 0x271   :  { %519 = vsyncadd [#allocation11], 4294967040 }
 0x272   :  { %352 = vsyncpa [#allocation4], 1 }
 0x273   :  { %353 = vsyncpa [#allocation7], 1 }
 0x274   :  { %354 = vsyncpa [#allocation5], 1 }
 0x275   :  { %355 = vsyncpa [#allocation11], 1 }

</bundles_post_ra>
